<compile_context>
chip_gen: v6e
topology: v6e:2x2x1
jax: 0.10.0
libtpu: 0.0.40
codegen_flags: <defaults>
</compile_context>

<pallas_src>
import math

import jax
import jax.numpy as jnp
from jax.experimental import pallas as pl
from jax.experimental.pallas import tpu as pltpu


def _round_up(v, m):
    return ((v + m - 1) // m) * m


def _patch_matmul_gelu_kernel(p_ref, w_ref, b_ref, o_ref):
    """One row-tile of patches -> conv projection + bias + exact GELU."""
    acc = jnp.dot(p_ref[...], w_ref[...], preferred_element_type=jnp.float32)
    acc = acc + b_ref[...]
    # exact (erf-based) GELU, matching torch.nn.GELU() default (approximate='none')
    out = 0.5 * acc * (1.0 + jax.lax.erf(acc * 0.7071067811865476))
    o_ref[...] = out.astype(o_ref.dtype)


def _choose_row_tile(M, K, C_out, in_itemsize, out_itemsize, tm_max):
    """Balanced row tile: big enough for the HBM roofline, small enough for
    VMEM, and >= 2 grid steps when there is enough work (v7x has 2 TCs)."""
    row_align = max(8, 32 // in_itemsize)            # 8 for f32, 16 for bf16
    # VMEM budget for the double-buffered (in + out) row tiles; the resident
    # weight/bias come on top and are accounted for in vmem_limit_bytes.
    row_bytes = 2 * (K * in_itemsize + C_out * out_itemsize)
    tm_vmem_cap = max(row_align, ((24 << 20) // row_bytes) // row_align * row_align)
    tm_cap = max(row_align, min(tm_max, tm_vmem_cap))

    n_steps = pl.cdiv(M, tm_cap)
    if M >= 256:                       # enough rows to feed two TensorCores
        n_steps = max(n_steps, 2)
    return _round_up(pl.cdiv(M, n_steps), row_align)


def cube_embed_sal_forward(x, weight, bias,
                           kernel=(5, 5, 8), stride=(5, 5, 8), padding=(0, 1, 1),
                           tm_max=512, use_bf16=False):
    """Forward pass of CubeEmbed_sal.

    x:      (N, C_in, D, H, W)
    weight: (C_out, C_in, kD, kH, kW)   (PyTorch Conv3d layout)
    bias:   (C_out,)
    returns (y, y.shape) with y: (N, C_out, D_out, H_out, W_out)
    """
    N, C, D, H, W = x.shape
    kD, kH, kW = kernel
    sD, sH, sW = stride
    pD, pH, pW = padding
    # stride == kernel in this module -> non-overlapping patch extraction
    assert (kD, kH, kW) == (sD, sH, sW), "CubeEmbed_sal uses stride == kernel"

    Do = (D + 2 * pD - kD) // sD + 1
    Ho = (H + 2 * pH - kH) // sH + 1
    Wo = (W + 2 * pW - kW) // sW + 1

    C_out = weight.shape[0]
    K = C * kD * kH * kW
    M = N * Do * Ho * Wo

    compute_dtype = jnp.bfloat16 if use_bf16 else x.dtype
    out_dtype = x.dtype

    # Conv3d zero padding, then trim to the region covered by whole patches.
    xp = jnp.pad(x, ((0, 0), (0, 0), (pD, pD), (pH, pH), (pW, pW)))
    xp = xp[:, :, : Do * sD, : Ho * sH, : Wo * sW]

    # Non-overlapping cube extraction (space-to-depth); inner order
    # (C, kD, kH, kW) matches PyTorch's Conv3d weight flattening.  The dtype
    # cast fuses into this transpose; no further copies of the patch matrix.
    xp = xp.reshape(N, C, Do, kD, Ho, kH, Wo, kW)
    patches = xp.transpose(0, 2, 4, 6, 1, 3, 5, 7).reshape(M, K).astype(compute_dtype)

    w2d = weight.reshape(C_out, K).T.astype(compute_dtype)     # (K, C_out)
    b2d = bias.reshape(1, C_out).astype(jnp.float32)           # f32 add on f32 acc

    in_item = jnp.dtype(compute_dtype).itemsize
    out_item = jnp.dtype(out_dtype).itemsize
    tm = _choose_row_tile(M, K, C_out, in_item, out_item, tm_max)

    # Tiny-M corner case: the row tile may not exceed the array, so pad the
    # (small) patch matrix up to one tile.  For M >= tm the ragged last tile
    # is handled by Pallas: the overhanging rows read unspecified data that
    # only lands in rows whose writes are dropped (per-row independence).
    if M < tm:
        patches = jnp.pad(patches, ((0, tm - M), (0, 0)))
    M_rows = max(M, tm)
    grid_m = pl.cdiv(M_rows, tm)

    # Explicit VMEM budget: double-buffered in/out row tiles + resident
    # weight/bias (still double-buffered by the pipeliner) + slack.  Capped
    # at 56 MiB so it also fits v7x's 64 MiB VMEM.
    vmem_need = (2 * tm * K * in_item
                 + 2 * K * C_out * in_item
                 + 2 * C_out * 4
                 + 2 * tm * C_out * out_item)
    vmem_limit = int(min(max(vmem_need + (4 << 20), 32 << 20), 56 << 20))

    out_flat = pl.pallas_call(
        _patch_matmul_gelu_kernel,
        out_shape=jax.ShapeDtypeStruct((M_rows, C_out), out_dtype),
        grid_spec=pltpu.PrefetchScalarGridSpec(
            num_scalar_prefetch=0,
            grid=(grid_m,),
            in_specs=[
                pl.BlockSpec((tm, K), lambda i: (i, 0)),      # patch row tile
                # Constant index maps -> weight/bias stay VMEM-resident
                # (the pipeliner skips re-DMA when the block index repeats).
                pl.BlockSpec((K, C_out), lambda i: (0, 0)),   # full weight
                pl.BlockSpec((1, C_out), lambda i: (0, 0)),   # bias row
            ],
            out_specs=pl.BlockSpec((tm, C_out), lambda i: (i, 0)),
        ),
        compiler_params=pltpu.CompilerParams(
            dimension_semantics=("parallel",),
            vmem_limit_bytes=vmem_limit,
        ),
    )(patches, w2d, b2d)

    if M_rows != M:
        out_flat = out_flat[:M]
    # Channels-last rows -> NCDHW; single fused XLA transpose, no lane slice.
    y = out_flat.reshape(N, Do, Ho, Wo, C_out).transpose(0, 4, 1, 2, 3)
    return y, y.shape


def _reference_forward(x, weight, bias, kernel, stride, padding):
    """Pure-JAX reference: Conv3d (NCDHW) + exact GELU."""
    y = jax.lax.conv_general_dilated(
        x, weight,
        window_strides=stride,
        padding=[(p, p) for p in padding],
        dimension_numbers=("NCDHW", "OIDHW", "NCDHW"),
    )
    y = y + bias.reshape(1, -1, 1, 1, 1)
    return jax.nn.gelu(y, approximate=False)


if __name__ == "__main__":
    key = jax.random.PRNGKey(0)
    k_x, k_w, k_b, k_x2 = jax.random.split(key, 4)

    # module defaults: dim_in=1, dim_out=200, kernel=(5,5,8), stride=(5,5,8), padding=(0,1,1)
    dim_in, dim_out = 1, 200
    kernel = (5, 5, 8)
    stride = (5, 5, 8)
    padding = (0, 1, 1)

    fan_in = dim_in * kernel[0] * kernel[1] * kernel[2]
    weight = jax.random.normal(
        k_w, (dim_out, dim_in) + kernel, dtype=jnp.float32) / math.sqrt(fan_in)
    bias = jax.random.normal(k_b, (dim_out,), dtype=jnp.float32) * 0.02

    # case 1: tiny module-consistent input (2,1,5,8,14) -> (2,200,1,2,2); single tile.
    x1 = jax.random.normal(k_x, (2, dim_in, 5, 8, 14), dtype=jnp.float32)
    y1, shape1 = cube_embed_sal_forward(x1, weight, bias, kernel, stride, padding)
    y1 = jax.block_until_ready(y1)
    y1_ref = _reference_forward(x1, weight, bias, kernel, stride, padding)
    assert y1.shape == y1_ref.shape == shape1
    assert jnp.allclose(y1, y1_ref, atol=1e-4, rtol=1e-4), "case 1 mismatch vs conv+gelu"

    # case 2: exercises the multi-tile grid and the masked ragged last tile:
    # M = 2*2*5*13 = 260 patch rows -> 2 balanced tiles of 136 rows.
    x2 = jax.random.normal(k_x2, (2, dim_in, 10, 23, 102), dtype=jnp.float32)
    y2, _ = cube_embed_sal_forward(x2, weight, bias, kernel, stride, padding)
    y2 = jax.block_until_ready(y2)
    y2_ref = _reference_forward(x2, weight, bias, kernel, stride, padding)
    assert y2.shape == y2_ref.shape
    assert jnp.allclose(y2, y2_ref, atol=1e-4, rtol=1e-4), "case 2 mismatch vs conv+gelu"

    # case 3: bf16 MXU inputs (f32 accumulation) -- the v5e fast path; looser tolerance.
    y3, _ = cube_embed_sal_forward(x1, weight, bias, kernel, stride, padding, use_bf16=True)
    y3 = jax.block_until_ready(y3)
    assert jnp.allclose(y3, y1_ref, atol=5e-2, rtol=5e-2), "bf16 path mismatch"

    print("KERNEL_OK")
</pallas_src>

<mosaic_0001>
module attributes {stable_mosaic.version = 11 : i64} {
  func.func @_patch_matmul_gelu_kernel(%arg0: i32, %arg1: memref<8x200xf32, #tpu.memory_space<vmem>>, %arg2: memref<200x200xf32, #tpu.memory_space<vmem>>, %arg3: memref<1x200xf32, #tpu.memory_space<vmem>>, %arg4: memref<8x200xf32, #tpu.memory_space<vmem>>) attributes {dimension_semantics = [#tpu.dimension_semantics<parallel>], iteration_bounds = array<i64: 1>, scalar_prefetch = 0 : i64, scratch_operands = 0 : i64, tpu.core_type = #tpu.core_type<tc>, window_params = [{transform_indices = @transform_0, window_bounds = array<i64: 8, 200>}, {pipeline_mode = #tpu.pipeline_mode<synchronous>, transform_indices = @transform_1, window_bounds = array<i64: 200, 200>}, {pipeline_mode = #tpu.pipeline_mode<synchronous>, transform_indices = @transform_2, window_bounds = array<i64: 1, 200>}, {transform_indices = @transform_3, window_bounds = array<i64: 8, 200>}]} {
    %c0 = arith.constant 0 : index
    %c0_0 = arith.constant 0 : index
    %0 = vector.load %arg1[%c0, %c0_0] : memref<8x200xf32, #tpu.memory_space<vmem>>, vector<8x200xf32>
    %c0_1 = arith.constant 0 : index
    %c0_2 = arith.constant 0 : index
    %1 = vector.load %arg2[%c0_1, %c0_2] : memref<200x200xf32, #tpu.memory_space<vmem>>, vector<200x200xf32>
    %cst = arith.constant dense<0.000000e+00> : vector<8x200xf32>
    %2 = tpu.matmul %0, %1, %cst {dimension_numbers = #tpu.dot_dimension_numbers<[1], [0], [0], [1], [0, 0, 1, 1], [], []>} : vector<8x200xf32>, vector<200x200xf32>, vector<8x200xf32> -> vector<8x200xf32>
    %c0_3 = arith.constant 0 : index
    %c0_4 = arith.constant 0 : index
    %3 = vector.load %arg3[%c0_3, %c0_4] : memref<1x200xf32, #tpu.memory_space<vmem>>, vector<1x200xf32>
    %4 = vector.broadcast %3 : vector<1x200xf32> to vector<8x200xf32>
    %5 = arith.addf %2, %4 : vector<8x200xf32>
    %cst_5 = arith.constant 5.000000e-01 : f32
    %6 = vector.broadcast %cst_5 : f32 to vector<8x200xf32>
    %7 = arith.mulf %6, %5 : vector<8x200xf32>
    %cst_6 = arith.constant 0.707106769 : f32
    %8 = vector.broadcast %cst_6 : f32 to vector<8x200xf32>
    %9 = arith.mulf %5, %8 : vector<8x200xf32>
    %10 = math.erf %9 : vector<8x200xf32>
    %cst_7 = arith.constant 1.000000e+00 : f32
    %11 = vector.broadcast %cst_7 : f32 to vector<8x200xf32>
    %12 = arith.addf %11, %10 : vector<8x200xf32>
    %13 = arith.mulf %7, %12 : vector<8x200xf32>
    %c0_8 = arith.constant 0 : index
    %c0_9 = arith.constant 0 : index
    %14 = vector.load %arg4[%c0_8, %c0_9] : memref<8x200xf32, #tpu.memory_space<vmem>>, vector<8x200xf32>
    tpu.vector_store %arg4[%c0_8, %c0_9], %13 {strides = array<i32>} : memref<8x200xf32, #tpu.memory_space<vmem>>, vector<8x200xf32>,
    return
  }
  func.func @transform_0(%arg0: i32) -> (i32, i32) {
    %c0_i32 = arith.constant 0 : i32
    %c0_i32_0 = arith.constant 0 : i32
    return %arg0, %c0_i32 : i32, i32
  }
  func.func @transform_1(%arg0: i32) -> (i32, i32) {
    %c0_i32 = arith.constant 0 : i32
    %c0_i32_0 = arith.constant 0 : i32
    %c0_i32_1 = arith.constant 0 : i32
    return %c0_i32, %c0_i32_0 : i32, i32
  }
  func.func @transform_2(%arg0: i32) -> (i32, i32) {
    %c0_i32 = arith.constant 0 : i32
    %c0_i32_0 = arith.constant 0 : i32
    %c0_i32_1 = arith.constant 0 : i32
    return %c0_i32, %c0_i32_0 : i32, i32
  }
  func.func @transform_3(%arg0: i32) -> (i32, i32) {
    %c0_i32 = arith.constant 0 : i32
    %c0_i32_0 = arith.constant 0 : i32
    return %arg0, %c0_i32 : i32, i32
  }
}

</mosaic_0001>

<bundles_post_ra>
// kernel: tpu_custom_call.1
= control target key start
LH: loop header
LB: loop body
LE: loop exit
PB: predicated region body
PF: predicated region fallthrough
CT: control target
= control target key end

     0   :  { %8 = vsyncpa [#allocation3], 0  ;;  %s323_s0 = inlined_call_operand.hbm [shape: f32[8,200], index: 0, kind: input, shape index: {}]   ;;  %s324_s1 = inlined_call_operand.hbm [shape: f32[200,200], index: 1, kind: input, shape index: {}]   ;;  %s325_s2 = inlined_call_operand.vmem [shape: f32[1,200], index: 2, kind: input, shape index: {}]   ;;  %s326_s3 = inlined_call_operand.hbm [shape: f32[8,200], index: 3, kind: output, shape index: {}]  }
   0x1   :  { %9 = vsyncpa [#allocation6], 0 }
   0x2   :  { %10 = vsyncpa [#allocation4], 0  ;;  %s284_s12 = smov [#allocation2]   ;;  %s285_s14 = smov [#allocation5]  }
   0x3   :  { %s17_s13 = sshll.u32 %s284_s12, 4  ;;  %s26_s15 = sshll.u32 %s285_s14, 4  ;;  %s18_s13 = int_to_ptr.vmem [resolvable:$true] %s17_s13  ;;  %s27_s15 = int_to_ptr.vmem [resolvable:$true] %s26_s15 }
   0x4   :  { %s226_s16 = scalar_lea.vmem %s18_s13, 256  ;;  %p231_p1 = scmp.lt.s32.totalorder %s18_s13, %s18_s13 }
   0x5   :  { %p227_p0 = scmp.ne.s32.totalorder %s18_s13, %s226_s16  ;;  %p232_p2 = scmp.lt.s32.totalorder %s226_s16, %s226_s16 }
   0x7   :  { %p233_p3 = por %p232_p2, %p231_p1 }
   0x9   :  { %p234_p4 = pnand %p233_p3, %p227_p0 }
   0xb   :  { %237 = shalt.err (!%p234_p4)
}
   0xc   :  { %20 = dma.hbm_to_vmem [thread:$0]  %s323_s0, 256, %s18_s13, [#allocation3]  }
   0xd   :  { %s246_s19 = scalar_lea.vmem %s27_s15, 6400  ;;  %p251_p6 = scmp.lt.s32.totalorder %s27_s15, %s27_s15 }
   0xe   :  { %p247_p5 = scmp.ne.s32.totalorder %s27_s15, %s246_s19  ;;  %p252_p7 = scmp.lt.s32.totalorder %s246_s19, %s246_s19 }
  0x10   :  { %p253_p8 = por %p252_p7, %p251_p6 }
  0x12   :  { %p254_p9 = pnand %p253_p8, %p247_p5 }
  0x14   :  { %257 = shalt.err (!%p254_p9)
}
  0x15   :  { %s286_s20 = smov 256   ;;  %s287_s21 = smov 16  }
  0x16   :  { %32 = dma.hbm_to_vmem [thread:$0]  %s324_s1, 6400, %s27_s15, [#allocation6], %s286_s20, %s286_s20, %s287_s21  }
  0x17   :  { %278 = dma.done.wait [#allocation3], 256  }
  0x18   :  { %279 = vsyncadd [#allocation3], 4294967040 }
  0x19   :  { %280 = dma.done.wait [#allocation6], 6400  }
  0x1a   :  { %281 = vsyncadd [#allocation6], 4294960896  ;;  %v74_v0 = vld [vmem:[#allocation5 + $0xf8] sm:$0xff]  ;;  %v73_v1 = vld [vmem:[#allocation5 + $0xf0] sm:$0xff]  ;;  %vm105_vm0 = vcmask 588800   ;;  %v95_v52 = vlaneseq  ;;  %s288_s24 = smov [#allocation7]  }
  0x1b   :  { %v72_v2 = vld [vmem:[#allocation5 + $0xe8] sm:$0xff]  ;;  %109 = vmatprep.subr.mxu0 %v74_v0  ;;  %v71_v3 = vld [vmem:[#allocation5 + $0xe0] sm:$0xff]  ;;  %v70_v4 = vld [vmem:[#allocation5 + $0xd8] sm:$0xff]  ;;  %s198_s25 = sshll.u32 %s288_s24, 4  ;;  %s199_s25 = int_to_ptr.vmem [resolvable:$true] %s198_s25 }
  0x1c   :  { %110 = vmatpush1.msra.mxu0 %v73_v1  ;;  %v69_v5 = vld [vmem:[#allocation5 + $0xd0] sm:$0xff]  ;;  %v68_v6 = vld [vmem:[#allocation5 + $0xc8] sm:$0xff]  ;;  %v67_v7 = vld [vmem:[#allocation5 + $0xc0] sm:$0xff]  ;;  %v96_v53 = vshrl.u32 %v95_v52, 7  ;;  %p263_p11 = scmp.lt.s32.totalorder %s199_s25, %s199_s25 }
  0x1d   :  { %111 = vmatprep.subr.mxu0 %v72_v2  ;;  %v66_v8 = vld [vmem:[#allocation5 + $0xb8] sm:$0xff]  ;;  %v65_v9 = vld [vmem:[#allocation5 + $0xb0] sm:$0xff]  ;;  %v64_v10 = vld [vmem:[#allocation5 + $0xa8] sm:$0xff] }
  0x1e   :  { %112 = vmatpush1.msra.mxu0 %v71_v3  ;;  %v63_v11 = vld [vmem:[#allocation5 + $0xa0] sm:$0xff]  ;;  %v62_v12 = vld [vmem:[#allocation5 + $0x98] sm:$0xff]  ;;  %v61_v13 = vld [vmem:[#allocation5 + $0x90] sm:$0xff]  ;;  %v97_v54 = vsub.s32 0, %v96_v53  ;;  %v101_v56 = vsub.s32 1, %v96_v53 }
  0x1f   :  { %113 = vmatprep.subr.mxu0 %v70_v4  ;;  %v60_v14 = vld [vmem:[#allocation5 + $0x88] sm:$0xff]  ;;  %v59_v15 = vld [vmem:[#allocation5 + $0x80] sm:$0xff]  ;;  %v58_v16 = vld [vmem:[#allocation5 + $0x78] sm:$0xff] }
  0x20   :  { %114 = vmatpush1.msra.mxu0 %v69_v5  ;;  %v57_v17 = vld [vmem:[#allocation5 + $0x70] sm:$0xff]  ;;  %v56_v18 = vld [vmem:[#allocation5 + $0x68] sm:$0xff]  ;;  %v42_v19 = vld [vmem:[#allocation2 + $0x8] sm:$0xff] }
  0x21   :  { %115 = vmatprep.subr.mxu0 %v68_v6  ;;  %v55_v20 = vld [vmem:[#allocation5 + $0x60] sm:$0xff]  ;;  %208 = vmatprep.mubr.msk.f32.mxu0 %vm105_vm0, %v42_v19  ;;  %v54_v21 = vld [vmem:[#allocation5 + $0x58] sm:$0xff]  ;;  %v53_v22 = vld [vmem:[#allocation5 + $0x50] sm:$0xff] }
  0x22   :  { %116 = vmatpush1.msra.mxu0 %v67_v7  ;;  %v52_v23 = vld [vmem:[#allocation5 + $0x48] sm:$0xff]  ;;  %v51_v24 = vld [vmem:[#allocation5 + $0x40] sm:$0xff]  ;;  %v50_v25 = vld [vmem:[#allocation5 + $0x38] sm:$0xff] }
  0x23   :  { %117 = vmatprep.subr.mxu0 %v66_v8  ;;  %v49_v26 = vld [vmem:[#allocation5 + $0x30] sm:$0xff]  ;;  %v48_v27 = vld [vmem:[#allocation5 + $0x28] sm:$0xff]  ;;  %v47_v28 = vld [vmem:[#allocation5 + $0x20] sm:$0xff] }
  0x24   :  { %118 = vmatpush1.msra.mxu0 %v65_v9  ;;  %v46_v29 = vld [vmem:[#allocation5 + $0x18] sm:$0xff]  ;;  %v45_v30 = vld [vmem:[#allocation5 + $0x10] sm:$0xff]  ;;  %v44_v31 = vld [vmem:[#allocation5 + $0x8] sm:$0xff] }
  0x25   :  { %119 = vmatprep.subr.mxu0 %v64_v10  ;;  %v43_v32 = vld [vmem:[#allocation5] sm:$0xff]  ;;  %v92_v33 = vld [vmem:[#allocation5 + $0x188] sm:$0xff]  ;;  %v90_v35 = vld [vmem:[#allocation5 + $0x178] sm:$0xff] }
  0x26   :  { %120 = vmatpush1.msra.mxu0 %v63_v11  ;;  %v91_v34 = vld [vmem:[#allocation5 + $0x180] sm:$0xff]  ;;  %v89_v36 = vld [vmem:[#allocation5 + $0x170] sm:$0xff]  ;;  %v88_v37 = vld [vmem:[#allocation5 + $0x168] sm:$0xff] }
  0x27   :  { %121 = vmatprep.subr.mxu0 %v62_v12  ;;  %v87_v38 = vld [vmem:[#allocation5 + $0x160] sm:$0xff]  ;;  %v86_v39 = vld [vmem:[#allocation5 + $0x158] sm:$0xff]  ;;  %v85_v40 = vld [vmem:[#allocation5 + $0x150] sm:$0xff] }
  0x28   :  { %122 = vmatpush1.msra.mxu0 %v61_v13  ;;  %v84_v41 = vld [vmem:[#allocation5 + $0x148] sm:$0xff]  ;;  %v83_v42 = vld [vmem:[#allocation5 + $0x140] sm:$0xff]  ;;  %v82_v43 = vld [vmem:[#allocation5 + $0x138] sm:$0xff] }
  0x29   :  { %123 = vmatprep.subr.mxu0 %v60_v14  ;;  %v81_v44 = vld [vmem:[#allocation5 + $0x130] sm:$0xff]  ;;  %v80_v45 = vld [vmem:[#allocation5 + $0x128] sm:$0xff]  ;;  %v79_v46 = vld [vmem:[#allocation5 + $0x120] sm:$0xff] }
  0x2a   :  { %124 = vmatpush1.msra.mxu0 %v59_v15  ;;  %v78_v47 = vld [vmem:[#allocation5 + $0x118] sm:$0xff]  ;;  %v77_v48 = vld [vmem:[#allocation5 + $0x110] sm:$0xff]  ;;  %v76_v49 = vld [vmem:[#allocation5 + $0x108] sm:$0xff] }
  0x2b   :  { %125 = vmatprep.subr.mxu0 %v58_v16  ;;  %v75_v50 = vld [vmem:[#allocation5 + $0x100] sm:$0xff]  ;;  %v41_v51 = vld [vmem:[#allocation2] sm:$0xff] }
  0x2c   :  { %126 = vmatpush1.msra.mxu0 %v57_v17  ;;  %v93_v55 = vld [vmem:[%s325_s2] sm:$0x3]  ;;  %s258_s2 = scalar_lea.vmem %s199_s25, 256 }
  0x2d   :  { %127 = vmatprep.subr.mxu0 %v56_v18  ;;  %v98_v57 = vrot.slane %v93_v55, %v97_v54  ;;  %v102_v58 = vrot.slane %v93_v55, %v101_v56  ;;  %p259_p10 = scmp.ne.s32.totalorder %s199_s25, %s258_s2  ;;  %p264_p12 = scmp.lt.s32.totalorder %s258_s2, %s258_s2 }
  0x2e   :  { %128 = vmatpush1.msra.mxu0 %v55_v20 }
  0x2f   :  { %129 = vmatprep.subr.mxu0 %v54_v21  ;;  %p265_p13 = por %p264_p12, %p263_p11 }
  0x30   :  { %130 = vmatpush1.msra.mxu0 %v53_v22 }
  0x31   :  { %131 = vmatprep.subr.mxu0 %v52_v23  ;;  %p266_p0 = pnand %p265_p13, %p259_p10 }
  0x32   :  { %132 = vmatpush1.msra.mxu0 %v51_v24 }
  0x33   :  { %133 = vmatprep.subr.mxu0 %v50_v25 }
  0x34   :  { %134 = vmatpush1.msra.mxu0 %v49_v26 }
  0x35   :  { %135 = vmatprep.subr.mxu0 %v48_v27 }
  0x36   :  { %136 = vmatpush1.msra.mxu0 %v47_v28 }
  0x37   :  { %137 = vmatprep.subr.mxu0 %v46_v29 }
  0x38   :  { %138 = vmatpush1.msra.mxu0 %v45_v30 }
  0x39   :  { %139 = vmatprep.subr.mxu0 %v44_v31 }
  0x3a   :  { %140 = vmatpush1.msra.mxu0 %v43_v32 }
  0x3b   :  { %155 = vmatprep.subr.mxu0 %v92_v33 }
  0x3c   :  { %156 = vmatpush2.msra.mxu0 %v91_v34 }
  0x3d   :  { %157 = vmatprep.subr.mxu0 %v90_v35 }
  0x3e   :  { %158 = vmatpush2.msra.mxu0 %v89_v36 }
  0x3f   :  { %159 = vmatprep.subr.mxu0 %v88_v37 }
  0x40   :  { %160 = vmatpush2.msra.mxu0 %v87_v38 }
  0x41   :  { %161 = vmatprep.subr.mxu0 %v86_v39 }
  0x42   :  { %162 = vmatpush2.msra.mxu0 %v85_v40 }
  0x43   :  { %163 = vmatprep.subr.mxu0 %v84_v41 }
  0x44   :  { %164 = vmatpush2.msra.mxu0 %v83_v42 }
  0x45   :  { %165 = vmatprep.subr.mxu0 %v82_v43 }
  0x46   :  { %166 = vmatpush2.msra.mxu0 %v81_v44 }
  0x47   :  { %167 = vmatprep.subr.mxu0 %v80_v45 }
  0x48   :  { %168 = vmatpush2.msra.mxu0 %v79_v46 }
  0x49   :  { %169 = vmatprep.subr.mxu0 %v78_v47 }
  0x4a   :  { %170 = vmatpush2.msra.mxu0 %v77_v48 }
  0x4b   :  { %171 = vmatprep.subr.mxu0 %v76_v49 }
  0x4c   :  { %172 = vmatpush2.msra.mxu0 %v75_v50 }
  0x4d   :  { %174 = vmatmul.mubr.f32.vlgmr.msra.gmra.mxu0 %v41_v51 }
 0x10d   :  { %v175_v59 = vpop.f32.mrf.mxu0 }
 0x10e   :  { %v176_v60 = vadd.f32 %v175_v59, %v98_v57 }
 0x10f   :  { %v177_v61 = vpop.f32.mrf.mxu0 }
 0x110   :  { %v182_v62 = vmul.f32 0.70710677, %v176_v60  ;;  %v178_v63 = vadd.f32 %v177_v61, %v102_v58  ;;  %v180_v2 = vmul.f32 0.5, %v176_v60 }
 0x112   :  { %214 = verf.f32 %v182_v62  ;;  %v183_v0 = vmul.f32 0.70710677, %v178_v63  ;;  %v181_v6 = vmul.f32 0.5, %v178_v63 }
 0x114   :  { %216 = verf.f32 %v183_v0 }
 0x11f   :  { %v215_v1 = vpop.eup %214 }
 0x120   :  { %v186_v3 = vadd.f32 1.0, %v215_v1 }
 0x121   :  { %v217_v4 = vpop.eup %216 }
 0x122   :  { %v188_v5 = vmul.f32 %v186_v3, %v180_v2  ;;  %v187_v7 = vadd.f32 1.0, %v217_v4 }
 0x124   :  { %190 = vst [vmem:[#allocation7] sm:$0xff] %v188_v5  ;;  %v189_v8 = vmul.f32 %v187_v7, %v181_v6 }
 0x126   :  { %191 = vst.msk [vmem:[#allocation7 + $0x8] sm:$0xff] %vm105_vm0, %v189_v8 }
 0x127   :  { %269 = shalt.err (!%p266_p0)
}
 0x128   :  { %201 = dma.vmem_to_hbm [thread:$0]  %s199_s25, 256, %s326_s3, [#allocation4]  }
 0x129   :  { %282 = dma.done.wait [#allocation4], 256  }
 0x12a   :  { %283 = vsyncadd [#allocation4], 4294967040 }
 0x12b   :  { %205 = vsyncpa [#allocation3], 1 }
 0x12c   :  { %206 = vsyncpa [#allocation6], 1 }
 0x12d   :  { %207 = vsyncpa [#allocation4], 1 }

</bundles_post_ra>
